<compile_context>
chip_gen: v6e
topology: v6e:2x2x1
jax: 0.10.0
libtpu: 0.0.40
codegen_flags: <defaults>
</compile_context>

<pallas_src>
import functools

import jax
import jax.numpy as jnp
from jax.experimental import pallas as pl
from jax.experimental.pallas import tpu as pltpu

NUM_OPS = 18
# mag_mask from augment_ops(): 1.0 where op[1] is not None
MAG_MASK = [1., 1., 1., 1., 1., 1., 0., 0., 1., 1., 1., 1., 1., 1., 1., 0., 1., 1.]

# Deduplicated augmentation slabs: ops 8-12 and 15-17 are identity placeholders
# and share one slab.  op index -> unique slab index.
OP_TO_SLAB = [0, 1, 2, 3, 4, 5, 6, 7, 8, 8, 8, 8, 8, 9, 10, 8, 8, 8]
N_SLABS = 11


# ---------------------------------------------------------------------------
# Tiling helper
# ---------------------------------------------------------------------------
def _row_tile(M, HW, dtype_bytes=4, target_bytes=2 << 20):
    """Largest row tile with block bytes ~<= target, TM % 8 == 0 (or TM == M),
    and TM exactly dividing M (keeps blocks aligned on every TPU generation,
    incl. v7x's smaller VMEM)."""
    max_tm = max(8, target_bytes // max(1, HW * dtype_bytes))
    if M <= max_tm:
        return M
    tm = min(max_tm, M)
    tm -= tm % 8
    while tm >= 8:
        if M % tm == 0:
            return tm
        tm -= 8
    return M  # fallback: single full block (only hit for small/odd M)


def _per_row_channel_affine(scale_ref, bias_ref, row0, TM, C):
    """Build (TM,1) scale/bias columns from (C,) SMEM arrays; channel = row % C."""
    row = row0 + jax.lax.broadcasted_iota(jnp.int32, (TM, 1), 0)
    ch = row % C
    scale = jnp.zeros((TM, 1), jnp.float32)
    bias = jnp.zeros((TM, 1), jnp.float32)
    for c in range(C):  # C is a static Python int (3): unrolled where-chain
        m = ch == c
        scale = jnp.where(m, scale_ref[c], scale)
        bias = jnp.where(m, bias_ref[c], bias)
    return scale, bias


# ---------------------------------------------------------------------------
# Pallas kernels
# ---------------------------------------------------------------------------
def _row_affine_kernel(scale_ref, bias_ref, x_ref, o_ref, *, C, TM):
    # out = x * scale[ch] + bias[ch], ch = global_row % C ; scale/bias live in SMEM
    t = pl.program_id(0)
    scale, bias = _per_row_channel_affine(scale_ref, bias_ref, t * TM, TM, C)
    o_ref[...] = x_ref[...] * scale + bias


def _pallas_row_affine(x2d, scale_c, bias_c, C):
    M, HW = x2d.shape
    TM = _row_tile(M, HW)
    kernel = functools.partial(_row_affine_kernel, C=C, TM=TM)
    return pl.pallas_call(
        kernel,
        out_shape=jax.ShapeDtypeStruct((M, HW), jnp.float32),
        grid=(M // TM,),
        in_specs=[pl.BlockSpec(memory_space=pltpu.MemorySpace.SMEM),   # scale (C,)
                  pl.BlockSpec(memory_space=pltpu.MemorySpace.SMEM),   # bias  (C,)
                  pl.BlockSpec((TM, HW), lambda t: (t, 0))],
        out_specs=pl.BlockSpec((TM, HW), lambda t: (t, 0)),
        compiler_params=pltpu.CompilerParams(dimension_semantics=("parallel",)),
    )(scale_c.astype(jnp.float32), bias_c.astype(jnp.float32),
      x2d.astype(jnp.float32))


def _select_affine_kernel(slab_ref, scale_ref, bias_ref, aug_ref, o_ref, *, C, TM):
    # Hard one-hot select: the selected slab was already chosen by the
    # data-dependent index_map (slab_ref consumed there); here we just apply the
    # fused per-channel affine epilogue and write the lane-dense output block.
    del slab_ref
    t = pl.program_id(1)
    scale, bias = _per_row_channel_affine(scale_ref, bias_ref, t * TM, TM, C)
    o_ref[...] = aug_ref[...] * scale + bias


def _pallas_select_affine(aug4d, slab_idx, scale_c, bias_c, C):
    """aug4d: (A, N_SLABS, M, HW); slab_idx: (A,) int32. Only the selected slab
    per replica is DMA'd (scalar-prefetch + data-dependent index_map)."""
    A, _, M, HW = aug4d.shape
    TM = _row_tile(M, HW)
    kernel = functools.partial(_select_affine_kernel, C=C, TM=TM)
    return pl.pallas_call(
        kernel,
        out_shape=jax.ShapeDtypeStruct((A, M, HW), jnp.float32),
        grid_spec=pltpu.PrefetchScalarGridSpec(
            num_scalar_prefetch=1,
            grid=(A, M // TM),
            in_specs=[
                pl.BlockSpec(memory_space=pltpu.MemorySpace.SMEM),     # scale (C,)
                pl.BlockSpec(memory_space=pltpu.MemorySpace.SMEM),     # bias  (C,)
                pl.BlockSpec((None, None, TM, HW),
                             lambda a, t, slab_ref: (a, slab_ref[a], t, 0)),
            ],
            out_specs=pl.BlockSpec((None, TM, HW),
                                   lambda a, t, slab_ref: (a, t, 0)),
        ),
        compiler_params=pltpu.CompilerParams(
            dimension_semantics=("parallel", "parallel")),
    )(slab_idx.astype(jnp.int32), scale_c.astype(jnp.float32),
      bias_c.astype(jnp.float32), aug4d.astype(jnp.float32))


# ---------------------------------------------------------------------------
# Augmentation ops (JAX glue; applied to un-normalized images), deduplicated
# ---------------------------------------------------------------------------
def _apply_augment_ops(x, mags, key):
    """x: (BN, C, H, W) un-normalized images; mags: (NUM_OPS,) sigmoid magnitudes.
    Returns only the N_SLABS unique slabs (identity shared)."""
    BN, C, H, W = x.shape
    k_sign, k_perm = jax.random.split(key)
    signs = jnp.where(jax.random.uniform(k_sign, (NUM_OPS,)) > 0.5, 1.0, -1.0)
    slabs = []
    # 0..2: shift_r / shift_g / shift_b (min=0, max=1 -> value == mag)
    for c in range(3):
        delta = jnp.zeros((C,), x.dtype).at[c].set(mags[c] * signs[c])
        slabs.append(x + delta.reshape(1, C, 1, 1))
    # 3: random_brightness
    slabs.append(x + mags[3] * signs[3])
    # 4: random_contrast: alpha = value*scale + 1, scale in {max-1, -(1-min)}
    alpha = mags[4] * jnp.where(signs[4] > 0, 10.0 - 1.0, -(1.0 - 0.1)) + 1.0
    slabs.append(x * alpha)  # TODO(synk): autoF.contrast_adjust exact formula unavailable; using alpha*x
    # 5: solarize: threshold = 1 - value
    thr = 1.0 - mags[5]
    slabs.append(jnp.where(x >= thr, 1.0 - x, x))
    # 6: hflip, 7: vflip
    slabs.append(x[..., ::-1])
    slabs.append(x[..., ::-1, :])
    # 8: shared identity slab for ops 8-12, 15-17
    # TODO(synk): rotate/shift_x/shift_y/scale/self_mix/equalize/cutout (autoF /
    # host-side RNG geometric warps) unavailable; identity placeholders.
    slabs.append(x)
    # 9: posterize: (x*255).long() << s >> s cancels -> trunc(x*255)/255
    slabs.append(jnp.trunc(x * 255.0) / 255.0)
    # 10: sample_pairing: (1-v)*x + v*x[perm]
    perm = jax.random.permutation(k_perm, BN)
    v = mags[14]
    slabs.append((1.0 - v) * x + v * x[perm])
    return jnp.stack(slabs, axis=0)  # (N_SLABS, BN, C, H, W)


# ---------------------------------------------------------------------------
# L2TT forward (aug_num replicas batched into one pipeline)
# ---------------------------------------------------------------------------
@functools.partial(jax.jit, static_argnames=("aug_num", "steps"))
def l2tt_forward(params, support, query, labelS, labelQ, key,
                 aug_num=4, steps=5, temp=1.0):
    # labels only determine n_way in the reference and do not affect forward values
    del labelS, labelQ
    B, Ns, C, H, W = support.shape
    Nq = query.shape[1]
    N = Ns + Nq
    A = aug_num
    HW = H * W

    data = jnp.concatenate([support, query], axis=1)              # (B, N, C, H, W)

    # unnormalize once (shared by all replicas): x*std + mean   (tiled Pallas affine)
    data_un = _pallas_row_affine(data.reshape(B * N * C, HW),
                                 params['std'], params['mean'], C)
    x = jnp.broadcast_to(data_un.reshape(1, B * N, C, H, W), (A, B * N, C, H, W))

    scale_norm = (1.0 / params['std']).astype(jnp.float32)        # fused into last step
    bias_norm = (-params['mean'] / params['std']).astype(jnp.float32)
    scale_id = jnp.ones((C,), jnp.float32)
    bias_id = jnp.zeros((C,), jnp.float32)
    op_to_slab = jnp.asarray(OP_TO_SLAB, jnp.int32)

    op_index = []  # list of (A,) int32 per step
    for s in range(steps):
        p_full = params['probs'][s]
        m_full = params['mag_params'][s]
        if s == 0:
            logits = jnp.broadcast_to(p_full, (A, NUM_OPS))
            mag_logits = jnp.broadcast_to(m_full, (A, NUM_OPS))
        else:
            idx = tuple(op_index)                                 # per-replica gather
            logits = p_full[idx]                                  # (A, NUM_OPS)
            mag_logits = m_full[idx]
        mags = jax.nn.sigmoid(mag_logits)                         # (A, NUM_OPS)

        key, k_g, k_ops = jax.random.split(key, 3)
        # F.gumbel_softmax(hard=True): forward value is one-hot argmax of perturbed logits
        g = jax.random.gumbel(k_g, logits.shape, dtype=logits.dtype)
        op = jnp.argmax((logits + g) / temp, axis=-1)             # (A,)
        slab_idx = op_to_slab[op]                                 # (A,)

        # per-replica unique augmentation slabs (plain JAX glue)
        aug = jax.vmap(_apply_augment_ops)(x, mags, jax.random.split(k_ops, A))
        aug2d = aug.reshape(A, N_SLABS, B * N * C, HW)

        last = (s == steps - 1)
        x2d = _pallas_select_affine(
            aug2d, slab_idx,
            scale_norm if last else scale_id,                     # fuse normalize on last step
            bias_norm if last else bias_id, C)
        x = x2d.reshape(A, B * N, C, H, W)
        op_index.append(op)

    new_data = x.reshape(A, B, N, C, H, W)
    return new_data[:, :, :Ns], new_data[:, :, Ns:]


def init_l2tt_params(max_op_len, mean, std):
    # matches nn.Parameter(torch.zeros([num_ops]*(i+1))) for i in range(max_op_len)
    probs = [jnp.zeros((NUM_OPS,) * (i + 1), jnp.float32) for i in range(max_op_len)]
    mag_params = [jnp.zeros((NUM_OPS,) * (i + 1), jnp.float32) for i in range(max_op_len)]
    return {'probs': probs,
            'mag_params': mag_params,
            'mean': jnp.asarray(mean, jnp.float32),
            'std': jnp.asarray(std, jnp.float32),
            'mag_mask': jnp.asarray(MAG_MASK, jnp.float32)}


if __name__ == "__main__":
    key = jax.random.PRNGKey(0)
    B, Ns, Nq, C, H, W = 2, 2, 3, 3, 16, 16
    L = 3  # max_op_len (reference default is 5; kept small for the demo)
    mean = (0.485, 0.456, 0.406)
    std = (0.229, 0.224, 0.225)
    params = init_l2tt_params(L, mean, std)

    k_s, k_q, k_fwd = jax.random.split(key, 3)
    mean_a = params['mean'].reshape(1, 1, C, 1, 1)
    std_a = params['std'].reshape(1, 1, C, 1, 1)
    support = (jax.random.uniform(k_s, (B, Ns, C, H, W), jnp.float32) - mean_a) / std_a
    query = (jax.random.uniform(k_q, (B, Nq, C, H, W), jnp.float32) - mean_a) / std_a
    labelS = jnp.tile(jnp.arange(Ns, dtype=jnp.int32)[None, :], (B, 1))
    labelQ = jnp.tile(jnp.arange(Nq, dtype=jnp.int32)[None, :], (B, 1)) % Ns

    new_support, new_query = l2tt_forward(params, support, query, labelS, labelQ,
                                          k_fwd, aug_num=2, steps=L, temp=1.0)
    jax.block_until_ready((new_support, new_query))
    assert new_support.shape == (2, B, Ns, C, H, W)
    assert new_query.shape == (2, B, Nq, C, H, W)
    assert bool(jnp.all(jnp.isfinite(new_support))) and bool(jnp.all(jnp.isfinite(new_query)))
    print("KERNEL_OK")
</pallas_src>

<mosaic_0001>
module attributes {stable_mosaic.version = 11 : i64} {
  func.func @_row_affine_kernel(%arg0: i32, %arg1: memref<3xf32, #tpu.memory_space<smem>>, %arg2: memref<3xf32, #tpu.memory_space<smem>>, %arg3: memref<30x256xf32, #tpu.memory_space<vmem>>, %arg4: memref<30x256xf32, #tpu.memory_space<vmem>>) attributes {dimension_semantics = [#tpu.dimension_semantics<parallel>], iteration_bounds = array<i64: 1>, scalar_prefetch = 0 : i64, scratch_operands = 0 : i64, tpu.core_type = #tpu.core_type<tc>, window_params = [{transform_indices = @transform_0, window_bounds = array<i64: 3>}, {transform_indices = @transform_1, window_bounds = array<i64: 3>}, {transform_indices = @transform_2, window_bounds = array<i64: 30, 256>}, {transform_indices = @transform_3, window_bounds = array<i64: 30, 256>}]} {
    %c30_i32 = arith.constant 30 : i32
    %0 = arith.muli %arg0, %c30_i32 : i32
    %1 = tpu.iota {dimensions = array<i32: 0>} : vector<30x1xi32>
    %2 = vector.broadcast %0 : i32 to vector<30x1xi32>
    %3 = arith.addi %2, %1 : vector<30x1xi32>
    %c3_i32 = arith.constant 3 : i32
    %c0_i32 = arith.constant 0 : i32
    %4 = arith.cmpi eq, %c3_i32, %c0_i32 : i32
    %c1_i32 = arith.constant 1 : i32
    %5 = arith.select %4, %c1_i32, %c3_i32 : i32
    %6 = vector.broadcast %5 : i32 to vector<30x1xi32>
    %7 = arith.remsi %3, %6 : vector<30x1xi32>
    %c0_i32_0 = arith.constant 0 : i32
    %8 = vector.broadcast %c0_i32_0 : i32 to vector<30x1xi32>
    %9 = arith.cmpi ne, %7, %8 : vector<30x1xi32>
    %c0_i32_1 = arith.constant 0 : i32
    %10 = vector.broadcast %c0_i32_1 : i32 to vector<30x1xi32>
    %11 = arith.cmpi slt, %7, %10 : vector<30x1xi32>
    %c0_i32_2 = arith.constant 0 : i32
    %12 = arith.cmpi slt, %5, %c0_i32_2 : i32
    %13 = vector.broadcast %12 : i1 to vector<30x1xi1>
    %14 = vector.broadcast %13 : vector<30x1xi1> to vector<30x1xi1>
    %15 = arith.xori %11, %14 : vector<30x1xi1>
    %16 = arith.andi %15, %9 : vector<30x1xi1>
    %17 = vector.broadcast %5 : i32 to vector<30x1xi32>
    %18 = arith.addi %7, %17 : vector<30x1xi32>
    %19 = arith.select %16, %18, %7 : vector<30x1xi1>, vector<30x1xi32>
    %cst = arith.constant 0.000000e+00 : f32
    %20 = vector.broadcast %cst : f32 to vector<30x1xf32>
    %cst_3 = arith.constant 0.000000e+00 : f32
    %21 = vector.broadcast %cst_3 : f32 to vector<30x1xf32>
    %c0_i32_4 = arith.constant 0 : i32
    %22 = vector.broadcast %c0_i32_4 : i32 to vector<30x1xi32>
    %23 = arith.cmpi eq, %19, %22 : vector<30x1xi32>
    %c0 = arith.constant 0 : index
    %24 = memref.load %arg1[%c0] : memref<3xf32, #tpu.memory_space<smem>>
    %25 = vector.broadcast %24 : f32 to vector<30x1xf32>
    %26 = arith.select %23, %25, %20 : vector<30x1xi1>, vector<30x1xf32>
    %c0_5 = arith.constant 0 : index
    %27 = memref.load %arg2[%c0_5] : memref<3xf32, #tpu.memory_space<smem>>
    %28 = vector.broadcast %27 : f32 to vector<30x1xf32>
    %29 = arith.select %23, %28, %21 : vector<30x1xi1>, vector<30x1xf32>
    %c1_i32_6 = arith.constant 1 : i32
    %30 = vector.broadcast %c1_i32_6 : i32 to vector<30x1xi32>
    %31 = arith.cmpi eq, %19, %30 : vector<30x1xi32>
    %c1 = arith.constant 1 : index
    %32 = memref.load %arg1[%c1] : memref<3xf32, #tpu.memory_space<smem>>
    %33 = vector.broadcast %32 : f32 to vector<30x1xf32>
    %34 = arith.select %31, %33, %26 : vector<30x1xi1>, vector<30x1xf32>
    %c1_7 = arith.constant 1 : index
    %35 = memref.load %arg2[%c1_7] : memref<3xf32, #tpu.memory_space<smem>>
    %36 = vector.broadcast %35 : f32 to vector<30x1xf32>
    %37 = arith.select %31, %36, %29 : vector<30x1xi1>, vector<30x1xf32>
    %c2_i32 = arith.constant 2 : i32
    %38 = vector.broadcast %c2_i32 : i32 to vector<30x1xi32>
    %39 = arith.cmpi eq, %19, %38 : vector<30x1xi32>
    %c2 = arith.constant 2 : index
    %40 = memref.load %arg1[%c2] : memref<3xf32, #tpu.memory_space<smem>>
    %41 = vector.broadcast %40 : f32 to vector<30x1xf32>
    %42 = arith.select %39, %41, %34 : vector<30x1xi1>, vector<30x1xf32>
    %c2_8 = arith.constant 2 : index
    %43 = memref.load %arg2[%c2_8] : memref<3xf32, #tpu.memory_space<smem>>
    %44 = vector.broadcast %43 : f32 to vector<30x1xf32>
    %45 = arith.select %39, %44, %37 : vector<30x1xi1>, vector<30x1xf32>
    %c0_9 = arith.constant 0 : index
    %c0_10 = arith.constant 0 : index
    %46 = vector.load %arg3[%c0_9, %c0_10] : memref<30x256xf32, #tpu.memory_space<vmem>>, vector<30x256xf32>
    %47 = vector.broadcast %42 : vector<30x1xf32> to vector<30x256xf32>
    %48 = arith.mulf %46, %47 : vector<30x256xf32>
    %49 = vector.broadcast %45 : vector<30x1xf32> to vector<30x256xf32>
    %50 = arith.addf %48, %49 : vector<30x256xf32>
    %c0_11 = arith.constant 0 : index
    %c0_12 = arith.constant 0 : index
    %51 = vector.load %arg4[%c0_11, %c0_12] : memref<30x256xf32, #tpu.memory_space<vmem>>, vector<30x256xf32>
    tpu.vector_store %arg4[%c0_11, %c0_12], %50 {strides = array<i32>} : memref<30x256xf32, #tpu.memory_space<vmem>>, vector<30x256xf32>,
    return
  }
  func.func @transform_0(%arg0: i32) -> i32 {
    %c0_i32 = arith.constant 0 : i32
    %c0_i32_0 = arith.constant 0 : i32
    return %c0_i32 : i32
  }
  func.func @transform_1(%arg0: i32) -> i32 {
    %c0_i32 = arith.constant 0 : i32
    %c0_i32_0 = arith.constant 0 : i32
    return %c0_i32 : i32
  }
  func.func @transform_2(%arg0: i32) -> (i32, i32) {
    %c0_i32 = arith.constant 0 : i32
    %c0_i32_0 = arith.constant 0 : i32
    return %arg0, %c0_i32 : i32, i32
  }
  func.func @transform_3(%arg0: i32) -> (i32, i32) {
    %c0_i32 = arith.constant 0 : i32
    %c0_i32_0 = arith.constant 0 : i32
    return %arg0, %c0_i32 : i32, i32
  }
}

module attributes {stable_mosaic.version = 11 : i64} {
  func.func @_select_affine_kernel(%arg0: i32, %arg1: i32, %arg2: memref<2xi32, #tpu.memory_space<smem>>, %arg3: memref<3xf32, #tpu.memory_space<smem>>, %arg4: memref<3xf32, #tpu.memory_space<smem>>, %arg5: memref<1x1x30x256xf32, #tpu.memory_space<vmem>>, %arg6: memref<1x30x256xf32, #tpu.memory_space<vmem>>) attributes {dimension_semantics = [#tpu.dimension_semantics<parallel>, #tpu.dimension_semantics<parallel>], iteration_bounds = array<i64: 2, 1>, scalar_prefetch = 1 : i64, scratch_operands = 0 : i64, tpu.core_type = #tpu.core_type<tc>, window_params = [{transform_indices = @transform_0, window_bounds = array<i64: 3>}, {transform_indices = @transform_1, window_bounds = array<i64: 3>}, {transform_indices = @transform_2, window_bounds = array<i64: 1, 1, 30, 256>}, {transform_indices = @transform_3, window_bounds = array<i64: 1, 30, 256>}]} {
    %c30_i32 = arith.constant 30 : i32
    %0 = arith.muli %arg1, %c30_i32 : i32
    %1 = tpu.iota {dimensions = array<i32: 0>} : vector<30x1xi32>
    %2 = vector.broadcast %0 : i32 to vector<30x1xi32>
    %3 = arith.addi %2, %1 : vector<30x1xi32>
    %c3_i32 = arith.constant 3 : i32
    %c0_i32 = arith.constant 0 : i32
    %4 = arith.cmpi eq, %c3_i32, %c0_i32 : i32
    %c1_i32 = arith.constant 1 : i32
    %5 = arith.select %4, %c1_i32, %c3_i32 : i32
    %6 = vector.broadcast %5 : i32 to vector<30x1xi32>
    %7 = arith.remsi %3, %6 : vector<30x1xi32>
    %c0_i32_0 = arith.constant 0 : i32
    %8 = vector.broadcast %c0_i32_0 : i32 to vector<30x1xi32>
    %9 = arith.cmpi ne, %7, %8 : vector<30x1xi32>
    %c0_i32_1 = arith.constant 0 : i32
    %10 = vector.broadcast %c0_i32_1 : i32 to vector<30x1xi32>
    %11 = arith.cmpi slt, %7, %10 : vector<30x1xi32>
    %c0_i32_2 = arith.constant 0 : i32
    %12 = arith.cmpi slt, %5, %c0_i32_2 : i32
    %13 = vector.broadcast %12 : i1 to vector<30x1xi1>
    %14 = vector.broadcast %13 : vector<30x1xi1> to vector<30x1xi1>
    %15 = arith.xori %11, %14 : vector<30x1xi1>
    %16 = arith.andi %15, %9 : vector<30x1xi1>
    %17 = vector.broadcast %5 : i32 to vector<30x1xi32>
    %18 = arith.addi %7, %17 : vector<30x1xi32>
    %19 = arith.select %16, %18, %7 : vector<30x1xi1>, vector<30x1xi32>
    %cst = arith.constant 0.000000e+00 : f32
    %20 = vector.broadcast %cst : f32 to vector<30x1xf32>
    %cst_3 = arith.constant 0.000000e+00 : f32
    %21 = vector.broadcast %cst_3 : f32 to vector<30x1xf32>
    %c0_i32_4 = arith.constant 0 : i32
    %22 = vector.broadcast %c0_i32_4 : i32 to vector<30x1xi32>
    %23 = arith.cmpi eq, %19, %22 : vector<30x1xi32>
    %c0 = arith.constant 0 : index
    %24 = memref.load %arg3[%c0] : memref<3xf32, #tpu.memory_space<smem>>
    %25 = vector.broadcast %24 : f32 to vector<30x1xf32>
    %26 = arith.select %23, %25, %20 : vector<30x1xi1>, vector<30x1xf32>
    %c0_5 = arith.constant 0 : index
    %27 = memref.load %arg4[%c0_5] : memref<3xf32, #tpu.memory_space<smem>>
    %28 = vector.broadcast %27 : f32 to vector<30x1xf32>
    %29 = arith.select %23, %28, %21 : vector<30x1xi1>, vector<30x1xf32>
    %c1_i32_6 = arith.constant 1 : i32
    %30 = vector.broadcast %c1_i32_6 : i32 to vector<30x1xi32>
    %31 = arith.cmpi eq, %19, %30 : vector<30x1xi32>
    %c1 = arith.constant 1 : index
    %32 = memref.load %arg3[%c1] : memref<3xf32, #tpu.memory_space<smem>>
    %33 = vector.broadcast %32 : f32 to vector<30x1xf32>
    %34 = arith.select %31, %33, %26 : vector<30x1xi1>, vector<30x1xf32>
    %c1_7 = arith.constant 1 : index
    %35 = memref.load %arg4[%c1_7] : memref<3xf32, #tpu.memory_space<smem>>
    %36 = vector.broadcast %35 : f32 to vector<30x1xf32>
    %37 = arith.select %31, %36, %29 : vector<30x1xi1>, vector<30x1xf32>
    %c2_i32 = arith.constant 2 : i32
    %38 = vector.broadcast %c2_i32 : i32 to vector<30x1xi32>
    %39 = arith.cmpi eq, %19, %38 : vector<30x1xi32>
    %c2 = arith.constant 2 : index
    %40 = memref.load %arg3[%c2] : memref<3xf32, #tpu.memory_space<smem>>
    %41 = vector.broadcast %40 : f32 to vector<30x1xf32>
    %42 = arith.select %39, %41, %34 : vector<30x1xi1>, vector<30x1xf32>
    %c2_8 = arith.constant 2 : index
    %43 = memref.load %arg4[%c2_8] : memref<3xf32, #tpu.memory_space<smem>>
    %44 = vector.broadcast %43 : f32 to vector<30x1xf32>
    %45 = arith.select %39, %44, %37 : vector<30x1xi1>, vector<30x1xf32>
    %c0_9 = arith.constant 0 : index
    %c0_10 = arith.constant 0 : index
    %c0_11 = arith.constant 0 : index
    %c0_12 = arith.constant 0 : index
    %46 = vector.load %arg5[%c0_9, %c0_10, %c0_11, %c0_12] : memref<1x1x30x256xf32, #tpu.memory_space<vmem>>, vector<1x1x30x256xf32>
    %47 = vector.shape_cast %46 : vector<1x1x30x256xf32> to vector<30x256xf32>
    %48 = vector.broadcast %42 : vector<30x1xf32> to vector<30x256xf32>
    %49 = arith.mulf %47, %48 : vector<30x256xf32>
    %50 = vector.broadcast %45 : vector<30x1xf32> to vector<30x256xf32>
    %51 = arith.addf %49, %50 : vector<30x256xf32>
    %c0_13 = arith.constant 0 : index
    %c0_14 = arith.constant 0 : index
    %c0_15 = arith.constant 0 : index
    %52 = vector.load %arg6[%c0_13, %c0_14, %c0_15] : memref<1x30x256xf32, #tpu.memory_space<vmem>>, vector<1x30x256xf32>
    %53 = vector.shape_cast %52 : vector<1x30x256xf32> to vector<30x256xf32>
    %54 = vector.shape_cast %51 : vector<30x256xf32> to vector<1x30x256xf32>
    tpu.vector_store %arg6[%c0_13, %c0_14, %c0_15], %54 {strides = array<i32>} : memref<1x30x256xf32, #tpu.memory_space<vmem>>, vector<1x30x256xf32>,
    return
  }
  func.func @transform_0(%arg0: i32, %arg1: i32, %arg2: memref<2xi32, #tpu.memory_space<smem>>) -> i32 {
    %c0_i32 = arith.constant 0 : i32
    %c0_i32_0 = arith.constant 0 : i32
    return %c0_i32 : i32
  }
  func.func @transform_1(%arg0: i32, %arg1: i32, %arg2: memref<2xi32, #tpu.memory_space<smem>>) -> i32 {
    %c0_i32 = arith.constant 0 : i32
    %c0_i32_0 = arith.constant 0 : i32
    return %c0_i32 : i32
  }
  func.func @transform_2(%arg0: i32, %arg1: i32, %arg2: memref<2xi32, #tpu.memory_space<smem>>) -> (i32, i32, i32, i32) {
    %0 = arith.index_cast %arg0 : i32 to index
    %1 = memref.load %arg2[%0] : memref<2xi32, #tpu.memory_space<smem>>
    %c0_i32 = arith.constant 0 : i32
    %c0_i32_0 = arith.constant 0 : i32
    return %arg0, %1, %arg1, %c0_i32 : i32, i32, i32, i32
  }
  func.func @transform_3(%arg0: i32, %arg1: i32, %arg2: memref<2xi32, #tpu.memory_space<smem>>) -> (i32, i32, i32) {
    %c0_i32 = arith.constant 0 : i32
    %c0_i32_0 = arith.constant 0 : i32
    return %arg0, %arg1, %c0_i32 : i32, i32, i32
  }
}

</mosaic_0001>

<bundles_post_ra>
// kernel: l2tt_forward.4
= control target key start
LH: loop header
LB: loop body
LE: loop exit
PB: predicated region body
PF: predicated region fallthrough
CT: control target
= control target key end

     0   :  { %8 = vsyncpa [#allocation3], 0  ;;  %s376_s0 = inlined_call_operand.vmem [shape: f32[3], index: 0, kind: input, shape index: {}]   ;;  %s377_s1 = inlined_call_operand.vmem [shape: f32[3], index: 1, kind: input, shape index: {}]   ;;  %s378_s2 = inlined_call_operand.vmem [shape: f32[30,256], index: 2, kind: input, shape index: {}]   ;;  %s379_s3 = inlined_call_operand.vmem [shape: f32[30,256], index: 3, kind: output, shape index: {}]  }
   0x1   :  { %s16_s14 = sshll.u32 %s376_s0, 4  ;;  %s17_s14 = int_to_ptr.vmem [resolvable:$true] %s16_s14 }
   0x2   :  { %9 = vsyncpa [#allocation5], 0  ;;  %s26_s17 = sshll.u32 %s377_s1, 4  ;;  %s214_s18 = scalar_lea.vmem %s17_s14, 16  ;;  %s27_s17 = int_to_ptr.vmem [resolvable:$true] %s26_s17 }
   0x3   :  { %p215_p0 = scmp.ne.s32.totalorder %s17_s14, %s214_s18  ;;  %p219_p1 = scmp.lt.s32.totalorder %s17_s14, %s17_s14 }
   0x4   :  { %p220_p2 = scmp.lt.s32.totalorder %s214_s18, %s214_s18 }
   0x6   :  { %p221_p3 = por %p220_p2, %p219_p1 }
   0x8   :  { %p222_p4 = pnand %p221_p3, %p215_p0 }
   0xa   :  { %225 = shalt.err (!%p222_p4)
}
   0xb   :  { %s242_s19 = smov [#allocation2]   ;;  %s226_s20 = scalar_lea.vmem %s27_s17, 16 }
   0xc   :  { %19 = dma.vmem_to_smem %s17_s14, 16, %s242_s19, [#allocation3]  }
   0xd   :  { %p227_p5 = scmp.ne.s32.totalorder %s27_s17, %s226_s20  ;;  %p231_p6 = scmp.lt.s32.totalorder %s27_s17, %s27_s17 }
   0xe   :  { %p232_p7 = scmp.lt.s32.totalorder %s226_s20, %s226_s20 }
  0x10   :  { %p233_p8 = por %p232_p7, %p231_p6 }
  0x12   :  { %p234_p9 = pnand %p233_p8, %p227_p5 }
  0x14   :  { %237 = shalt.err (!%p234_p9)
}
  0x15   :  { %s243_s0 = smov [#allocation4]  }
  0x16   :  { %29 = dma.vmem_to_smem %s27_s17, 16, %s243_s0, [#allocation5]  }
  0x17   :  { %238 = dma.done.wait [#allocation3], 16  }
  0x18   :  { %239 = vsyncadd [#allocation3], 4294967280 }
  0x19   :  { %240 = dma.done.wait [#allocation5], 16  }
  0x1a   :  { %241 = vsyncadd [#allocation5], 4294967280 }
  0x1b   :  { %38 = sfence }
  0x1c   :  { %v40_v0 = vlaneseq  ;;  %s118_s1 = sld [smem:[#allocation2]]  ;;  %v162_v35 = vld [vmem:[%s378_s2] sm:$0xff]  ;;  %v163_v36 = vld [vmem:[%s378_s2 + $0x8] sm:$0xff]  ;;  %v164_v48 = vld [vmem:[%s378_s2 + $0x10] sm:$0xff] }
  0x1d   :  { %s124_s21 = sld [smem:[#allocation4]]  ;;  %v165_v49 = vld [vmem:[%s378_s2 + $0x18] sm:$0xff]  ;;  %v166_v63 = vld [vmem:[%s378_s2 + $0x20] sm:$0xff] }
  0x1e   :  { %v41_v1 = vshrl.u32 %v40_v0, 7  ;;  %s200_s22 = sld [smem:[#allocation2 + $0x1]]  ;;  %v167_v0 = vld [vmem:[%s378_s2 + $0x28] sm:$0xff] }
  0x1f   :  { %s201_s23 = sld [smem:[#allocation4 + $0x1]] }
  0x20   :  { %v270_v2 = vmul.u32.u64.low 2863311531, %v41_v1  ;;  %v271_v3 = vmul.u32.u64.high 2863311531, %v41_v1, %v270_v2  ;;  %v42_v4 = vadd.s32 8, %v41_v1  ;;  %v43_v5 = vadd.s32 16, %v41_v1  ;;  %s202_s24 = sld [smem:[#allocation2 + $0x2]] }
  0x21   :  { %v273_v6 = vadd.s32 24, %v41_v1  ;;  %s203_s25 = sld [smem:[#allocation4 + $0x2]] }
  0x22   :  { %v275_v7 = vmul.u32.u64.low 2863311531, %v42_v4  ;;  %v276_v8 = vmul.u32.u64.high 2863311531, %v42_v4, %v275_v7  ;;  %v278_v9 = vmul.u32.u64.low 2863311531, %v43_v5  ;;  %v279_v10 = vmul.u32.u64.high 2863311531, %v43_v5, %v278_v9 }
  0x23   :  { %v56_v11 = vshrl.u32 %v271_v3, 1  ;;  %v283_v12 = vmul.u32.u64.low 2863311531, %v273_v6  ;;  %v284_v13 = vmul.u32.u64.high 2863311531, %v273_v6, %v283_v12  ;;  %v288_v18 = vstv %s118_s1 }
  0x24   :  { %v67_v15 = vshrl.u32 %v276_v8, 1  ;;  %v78_v16 = vshrl.u32 %v279_v10, 1  ;;  %v291_v21 = vstv %s124_s21  ;;  %v293_v22 = vstv %s200_s22 }
  0x25   :  { %v57_v14 = vmul.u32 3, %v56_v11  ;;  %v89_v20 = vshrl.u32 %v284_v13, 1  ;;  %v295_v23 = vstv %s201_s23  ;;  %v168_v13 = vld [vmem:[%s378_s2 + $0x30] sm:$0x3f] }
  0x26   :  { %v68_v19 = vmul.u32 3, %v67_v15  ;;  %v79_v24 = vmul.u32 3, %v78_v16  ;;  %v297_v27 = vstv %s202_s24 }
  0x27   :  { %v58_v17 = vsub.s32 %v41_v1, %v57_v14  ;;  %v299_v28 = vstv %s203_s25  ;;  %v90_v30 = vmul.u32 3, %v89_v20  ;;  %v169_v14 = vld [vmem:[%s378_s2 + $0x38] sm:$0x3f] }
  0x28   :  { %v69_v26 = vsub.s32 %v42_v4, %v68_v19  ;;  %v80_v29 = vsub.s32 %v43_v5, %v79_v24 }
  0x29   :  { %vm94_vm0 = vcmp.ne.s32.totalorder %v58_v17, 0  ;;  %vm98_vm1 = vcmp.lt.s32.totalorder %v58_v17, 0  ;;  %v106_v25 = vadd.s32 3, %v58_v17  ;;  %v91_v51 = vsub.s32 %v273_v6, %v90_v30 }
  0x2a   :  { %vm102_vm2 = vmand %vm98_vm1, %vm94_vm0  ;;  %vm95_vm3 = vcmp.ne.s32.totalorder %v69_v26, 0  ;;  %vm99_vm4 = vcmp.lt.s32.totalorder %v69_v26, 0  ;;  %v107_v32 = vadd.s32 3, %v69_v26  ;;  %vm96_vm9 = vcmp.ne.s32.totalorder %v80_v29, 0 }
  0x2b   :  { %v110_v31 = vsel %vm102_vm2, %v106_v25, %v58_v17  ;;  %vm103_vm8 = vmand %vm99_vm4, %vm95_vm3  ;;  %vm100_vm10 = vcmp.lt.s32.totalorder %v80_v29, 0  ;;  %v108_v50 = vadd.s32 3, %v80_v29  ;;  %vm97_vm15 = vcmp.ne.s32.totalorder %v91_v51, 0 }
  0x2c   :  { %vm114_vm5 = vcmp.eq.s32.totalorder %v110_v31, 0  ;;  %vm130_vm6 = vcmp.eq.s32.totalorder %v110_v31, 1  ;;  %vm146_vm7 = vcmp.eq.s32.totalorder %v110_v31, 2  ;;  %v111_v37 = vsel %vm103_vm8, %v107_v32, %v69_v26  ;;  %vm104_vm13 = vmand %vm100_vm10, %vm96_vm9 }
  0x2d   :  { %v120_v33 = vsel %vm114_vm5, %v288_v18, 0.0  ;;  %v126_v34 = vsel %vm114_vm5, %v291_v21, 0.0  ;;  %vm115_vm11 = vcmp.eq.s32.totalorder %v111_v37, 0  ;;  %vm131_vm12 = vcmp.eq.s32.totalorder %v111_v37, 1 }
  0x2e   :  { %v136_v38 = vsel %vm130_vm6, %v293_v22, %v120_v33  ;;  %v142_v39 = vsel %vm130_vm6, %v295_v23, %v126_v34  ;;  %v121_v42 = vsel %vm115_vm11, %v288_v18, 0.0  ;;  %v127_v43 = vsel %vm115_vm11, %v291_v21, 0.0 }
  0x2f   :  { %v152_v40 = vsel %vm146_vm7, %v297_v27, %v136_v38  ;;  %v158_v41 = vsel %vm146_vm7, %v299_v28, %v142_v39  ;;  %v137_v46 = vsel %vm131_vm12, %v293_v22, %v121_v42  ;;  %v143_v47 = vsel %vm131_vm12, %v295_v23, %v127_v43 }
  0x30   :  { %v170_v44 = vmul.f32 %v162_v35, %v152_v40  ;;  %v171_v45 = vmul.f32 %v163_v36, %v152_v40  ;;  %vm147_vm14 = vcmp.eq.s32.totalorder %v111_v37, 2  ;;  %v112_v58 = vsel %vm104_vm13, %v108_v50, %v80_v29 }
  0x31   :  { %v153_v54 = vsel %vm147_vm14, %v297_v27, %v137_v46  ;;  %v159_v55 = vsel %vm147_vm14, %v299_v28, %v143_v47  ;;  %vm116_vm0 = vcmp.eq.s32.totalorder %v112_v58, 0  ;;  %vm132_vm1 = vcmp.eq.s32.totalorder %v112_v58, 1 }
  0x32   :  { %v178_v52 = vadd.f32 %v170_v44, %v158_v41  ;;  %v179_v53 = vadd.f32 %v171_v45, %v158_v41  ;;  %v172_v56 = vmul.f32 %v164_v48, %v153_v54  ;;  %v173_v57 = vmul.f32 %v165_v49, %v153_v54 }
  0x33   :  { %vm148_vm2 = vcmp.eq.s32.totalorder %v112_v58, 2  ;;  %vm101_vm3 = vcmp.lt.s32.totalorder %v91_v51, 0  ;;  %v122_v61 = vsel %vm116_vm0, %v288_v18, 0.0  ;;  %v128_v62 = vsel %vm116_vm0, %v291_v21, 0.0 }
  0x34   :  { %186 = vst [vmem:[%s379_s3] sm:$0xff] %v178_v52  ;;  %187 = vst [vmem:[%s379_s3 + $0x8] sm:$0xff] %v179_v53  ;;  %v180_v59 = vadd.f32 %v172_v56, %v159_v55  ;;  %v181_v60 = vadd.f32 %v173_v57, %v159_v55  ;;  %v138_v1 = vsel %vm132_vm1, %v293_v22, %v122_v61  ;;  %v109_v3 = vadd.s32 3, %v91_v51 }
  0x35   :  { %vm105_vm4 = vmand %vm101_vm3, %vm97_vm15  ;;  %v144_v2 = vsel %vm132_vm1, %v295_v23, %v128_v62  ;;  %v154_v4 = vsel %vm148_vm2, %v297_v27, %v138_v1 }
  0x36   :  { %188 = vst [vmem:[%s379_s3 + $0x10] sm:$0xff] %v180_v59  ;;  %189 = vst [vmem:[%s379_s3 + $0x18] sm:$0xff] %v181_v60  ;;  %v160_v5 = vsel %vm148_vm2, %v299_v28, %v144_v2  ;;  %v174_v6 = vmul.f32 %v166_v63, %v154_v4  ;;  %v175_v7 = vmul.f32 %v167_v0, %v154_v4 }
  0x37   :  { %v113_v8 = vsel %vm105_vm4, %v109_v3, %v91_v51 }
  0x38   :  { %vm117_vm5 = vcmp.eq.s32.totalorder %v113_v8, 0  ;;  %vm133_vm6 = vcmp.eq.s32.totalorder %v113_v8, 1  ;;  %vm149_vm7 = vcmp.eq.s32.totalorder %v113_v8, 2  ;;  %v182_v9 = vadd.f32 %v174_v6, %v160_v5 }
  0x39   :  { %v183_v10 = vadd.f32 %v175_v7, %v160_v5  ;;  %v123_v11 = vsel %vm117_vm5, %v288_v18, 0.0  ;;  %v129_v12 = vsel %vm117_vm5, %v291_v21, 0.0 }
  0x3a   :  { %v139_v15 = vsel %vm133_vm6, %v293_v22, %v123_v11  ;;  %v145_v16 = vsel %vm133_vm6, %v295_v23, %v129_v12  ;;  %190 = vst [vmem:[%s379_s3 + $0x20] sm:$0xff] %v182_v9 }
  0x3b   :  { %191 = vst [vmem:[%s379_s3 + $0x28] sm:$0xff] %v183_v10  ;;  %v155_v17 = vsel %vm149_vm7, %v297_v27, %v139_v15  ;;  %v161_v18 = vsel %vm149_vm7, %v299_v28, %v145_v16 }
  0x3c   :  { %v176_v19 = vmul.f32 %v168_v13, %v155_v17  ;;  %v177_v20 = vmul.f32 %v169_v14, %v155_v17 }
  0x3e   :  { %v184_v21 = vadd.f32 %v176_v19, %v161_v18  ;;  %v185_v24 = vadd.f32 %v177_v20, %v161_v18 }
  0x40   :  { %192 = vst [vmem:[%s379_s3 + $0x30] sm:$0x3f] %v184_v21  ;;  %193 = vst [vmem:[%s379_s3 + $0x38] sm:$0x3f] %v185_v24 }
  0x41   :  { %198 = vsyncpa [#allocation3], 1 }
  0x42   :  { %199 = vsyncpa [#allocation5], 1 }

// kernel: l2tt_forward.5
= control target key start
LH: loop header
LB: loop body
LE: loop exit
PB: predicated region body
PF: predicated region fallthrough
CT: control target
= control target key end

     0   :  { %s890_s0 = inlined_call_operand.vmem [shape: s32[2], index: 0, kind: input, shape index: {}]   ;;  %s891_s1 = inlined_call_operand.vmem [shape: f32[3], index: 1, kind: input, shape index: {}]   ;;  %s892_s2 = inlined_call_operand.vmem [shape: f32[3], index: 2, kind: input, shape index: {}]   ;;  %s893_s3 = inlined_call_operand.vmem [shape: f32[2,11,30,256], index: 3, kind: input, shape index: {}]   ;;  %s894_s4 = inlined_call_operand.vmem [shape: f32[2,30,256], index: 4, kind: output, shape index: {}]  }
   0x1   :  { %s9_s17 = sshll.u32 %s890_s0, 4  ;;  %s10_s17 = int_to_ptr.vmem [resolvable:$true] %s9_s17 }
   0x2   :  { %s624_s18 = scalar_lea.vmem %s10_s17, 16  ;;  %p629_p1 = scmp.lt.s32.totalorder %s10_s17, %s10_s17 }
   0x3   :  { %p625_p0 = scmp.ne.s32.totalorder %s10_s17, %s624_s18  ;;  %p630_p2 = scmp.lt.s32.totalorder %s624_s18, %s624_s18 }
   0x5   :  { %p631_p3 = por %p630_p2, %p629_p1 }
   0x7   :  { %p632_p4 = pnand %p631_p3, %p625_p0 }
   0x9   :  { %635 = shalt.err (!%p632_p4)  }
   0xa   :  { %s700_s19 = smov [#allocation3]  }
   0xb   :  { %12 = dma.vmem_to_smem %s10_s17, 16, %s700_s19, [#allocation2] }
   0xc   :  { %678 = dma.done.wait [#allocation2], 16 }
   0xd   :  { %679 = vsyncadd [#allocation2], 4294967280 }
   0xe   :  { %14 = sfence }
   0xf   :  { %15 = vsyncpa [#allocation5], 0 }
  0x10   :  { %16 = vsyncpa [#allocation7], 0  ;;  %s731_s20 = smov 0   ;;  %s733_s21 = smov 0  }
  0x11   :  { %s735_s0 = smov 0  }
  0x12 LB: > { %s549_s22 = sadd.s32 4294967295, %s698_s0   ;;  %s34_s23 = sadd.s32 1, %s694_s21  ;;  %s698_s0 = sphi %s735_s0, %s22_s0   ;;  %s694_s21 = sphi %s733_s21, %s904_s21   ;;  %s690_s20 = sphi %s731_s20, %s903_s20  }
  0x13   : > { %p36_p5 = scmp.ge.s32.totalorder %s34_s23, 2  ;;  %p551_p6 = scmp.ge.s32.totalorder %s698_s0, 1 }
  0x14   : > { %p141_p7 = scmp.lt.s32.totalorder %s698_s0, 3  ;;  %p756_p9 = scmp.eq.s32.totalorder %s549_s22, 0 }
  0x15   : > { %s906_s23 = smov (%p36_p5, %s34_s23), 0  ;;  %s154_s28 = sshll.u32 %s891_s1, 4  ;;  %s155_s28 = int_to_ptr.vmem [resolvable:$true] %s154_s28 }
  0x16   : > { %p752_p8 = pnand %p551_p6, %p141_p7  ;;  %s165_s5 = sshll.u32 %s892_s2, 4  ;;  %s166_s5 = int_to_ptr.vmem [resolvable:$true] %s165_s5 }
  0x17   : > { %s899_s25 = scalar_select %p756_p9, 1, 0 }
  0x18   : > { %s898_s24 = scalar_select %p752_p8, 1, 0 }
  0x19   : > { %p586_p10 = pneg %p752_p8  ;;  %s636_s7 = scalar_lea.vmem %s155_s28, 16 }
  0x1a   : > { %p637_p12 = scmp.ne.s32.totalorder %s155_s28, %s636_s7  ;;  %p644_p2 = scmp.lt.s32.totalorder %s155_s28, %s155_s28 }
  0x1b   : > { %p770_p11 = pnand %p756_p9, %p586_p10  ;;  %p645_p3 = scmp.lt.s32.totalorder %s636_s7, %s636_s7 }
  0x1d   : > { %p638_p13 = pneg %p770_p11  ;;  %p646_p4 = por %p645_p3, %p644_p2 }
  0x1f   : > { %p639_p0 = pnand %p638_p13, %p637_p12 }
  0x21   : > { %p640_p1 = pneg %p639_p0 }
  0x23   : > { %p647_p5 = pnand %p646_p4, %p640_p1 }
  0x25   : > { %650 = shalt.err (!%p647_p5)
}
  0x26   : > { %s701_s8 = smov [#allocation4]   ;;  %s651_s9 = scalar_lea.vmem %s166_s5, 16 }
  0x27   : > { %589 = dma.vmem_to_smem (!%p770_p11), %s155_s28, 16, %s701_s8, [#allocation5]  }
  0x28   : > { %p652_p6 = scmp.ne.s32.totalorder %s166_s5, %s651_s9  ;;  %p659_p9 = scmp.lt.s32.totalorder %s166_s5, %s166_s5 }
  0x29   : > { %p660_p8 = scmp.lt.s32.totalorder %s651_s9, %s651_s9 }
  0x2a   : > { %p654_p7 = pnand %p652_p6, %p638_p13 }
  0x2b   : > { %p661_p12 = por %p660_p8, %p659_p9 }
  0x2c   : > { %p655_p10 = pneg %p654_p7 }
  0x2e   : > { %p662_p0 = pnand %p661_p12, %p655_p10 }
  0x30   : > { %665 = shalt.err (!%p662_p0)
}
  0x31   : > { %s702_s10 = smov [#allocation6]   ;;  %p901_p1 = scmp.ne.s32.totalorder %s898_s24, 0 }
  0x32   : > { %592 = dma.vmem_to_smem (!%p770_p11), %s166_s5, 16, %s702_s10, [#allocation7]  }
  0x33   : > { %198 = sbr.rel (%p901_p1) target bundleno = 98 (0x62), region = 32  ;;  %p902_p2 = scmp.ne.s32.totalorder (!%p901_p1), %s899_s25, 0 }
  0x38   : > { %681 = dma.done.wait (%p902_p2), [#allocation5], 16  }
  0x39   : > { %683 = vsyncadd (%p902_p2), [#allocation5], 4294967280 }
  0x3a   : > { %685 = dma.done.wait (%p902_p2), [#allocation7], 16  }
  0x3b   : > { %687 = vsyncadd (%p902_p2), [#allocation7], 4294967280 }
  0x3c   : > { %208 = sfence }
  0x3d   : > { %s242_s11 = sld [smem:[#allocation3 + %s690_s20]]  ;;  %p244_p8 = scmp.lt.s32.totalorder %s690_s20, 1  ;;  %v271_v0 = vlaneseq }
  0x3e   : > { %s349_s12 = sld [smem:[#allocation4]] }
  0x3f   : > { %v272_v1 = vshrl.u32 %v271_v0, 7  ;;  %s908_s20 = smov (!%p244_p8, %s690_s20), 1  ;;  %s355_s13 = sld [smem:[#allocation6]] }
  0x40   : > { %s562_s14 = sld [smem:[#allocation4 + $0x1]]  ;;  %s569_s16 = smul.u32 88, %s908_s20 }
  0x41   : > { %v795_v2 = vmul.u32.u64.low 2863311531, %v272_v1  ;;  %v796_v3 = vmul.u32.u64.high 2863311531, %v272_v1, %v795_v2  ;;  %v273_v4 = vadd.s32 8, %v272_v1  ;;  %v274_v5 = vadd.s32 16, %v272_v1  ;;  %s563_s15 = sld [smem:[#allocation6 + $0x1]]  ;;  %s568_s28 = sshll.u32 %s908_s20, 6 }
  0x42   : > { %v798_v6 = vadd.s32 24, %v272_v1  ;;  %s564_s17 = sld [smem:[#allocation4 + $0x2]]  ;;  %s852_s30 = scalar_lea.vmem %s894_s4, %s568_s28 }
  0x43   : > { %p246_p9 = scmp.lt.s32.totalorder %s242_s11, 10  ;;  %v800_v7 = vmul.u32.u64.low 2863311531, %v273_v4  ;;  %v801_v8 = vmul.u32.u64.high 2863311531, %v273_v4, %v800_v7  ;;  %v804_v9 = vmul.u32.u64.low 2863311531, %v274_v5  ;;  %v805_v10 = vmul.u32.u64.high 2863311531, %v274_v5, %v804_v9  ;;  %s565_s18 = sld [smem:[#allocation6 + $0x2]] }
  0x44   : > { %v287_v11 = vshrl.u32 %v796_v3, 1  ;;  %v809_v12 = vmul.u32.u64.low 2863311531, %v798_v6  ;;  %v810_v13 = vmul.u32.u64.high 2863311531, %v798_v6, %v809_v12  ;;  %v814_v18 = vstv %s349_s12 }
  0x45   : > { %s910_s11 = smov (!%p246_p9, %s242_s11), 10  ;;  %v298_v15 = vshrl.u32 %v801_v8, 1  ;;  %v309_v16 = vshrl.u32 %v805_v10, 1  ;;  %v817_v21 = vstv %s355_s13 }
  0x46   : > { %s558_s19 = sshll.u32 %s910_s11, 3  ;;  %v288_v14 = vmul.u32 3, %v287_v11  ;;  %v320_v20 = vshrl.u32 %v810_v13, 1  ;;  %v819_v22 = vstv %s562_s14 }
  0x47   : > { %s254_s22 = sadd.s32 %s569_s16, %s558_s19  ;;  %v299_v19 = vmul.u32 3, %v298_v15  ;;  %v821_v23 = vstv %s563_s15  ;;  %v310_v24 = vmul.u32 3, %v309_v16 }
  0x48   : > { %s559_s24 = sshll.u32 %s254_s22, 3  ;;  %v289_v17 = vsub.s32 %v272_v1, %v288_v14  ;;  %v828_v27 = vstv %s564_s17  ;;  %v321_v30 = vmul.u32 3, %v320_v20 }
  0x49   : > { %v300_v26 = vsub.s32 %v273_v4, %v299_v19  ;;  %s826_s27 = scalar_lea.vmem %s893_s3, %s559_s24  ;;  %v830_v28 = vstv %s565_s18  ;;  %v311_v29 = vsub.s32 %v274_v5, %v310_v24 }
  0x4a   : > { %vm325_vm0 = vcmp.ne.s32.totalorder %v289_v17, 0  ;;  %vm329_vm1 = vcmp.lt.s32.totalorder %v289_v17, 0  ;;  %v337_v25 = vadd.s32 3, %v289_v17  ;;  %v393_v35 = vld [vmem:[%s826_s27] sm:$0xff]  ;;  %v394_v36 = vld [vmem:[%s826_s27 + $0x8] sm:$0xff]  ;;  %v395_v48 = vld [vmem:[%s826_s27 + $0x10] sm:$0xff]  ;;  %v322_v51 = vsub.s32 %v798_v6, %v321_v30 }
  0x4b   : > { %vm333_vm2 = vmand %vm329_vm1, %vm325_vm0  ;;  %vm326_vm3 = vcmp.ne.s32.totalorder %v300_v26, 0  ;;  %vm330_vm4 = vcmp.lt.s32.totalorder %v300_v26, 0  ;;  %v338_v32 = vadd.s32 3, %v300_v26  ;;  %vm327_vm9 = vcmp.ne.s32.totalorder %v311_v29, 0  ;;  %v396_v49 = vld [vmem:[%s826_s27 + $0x18] sm:$0xff]  ;;  %v397_v63 = vld [vmem:[%s826_s27 + $0x20] sm:$0xff] }
  0x4c   : > { %v341_v31 = vsel %vm333_vm2, %v337_v25, %v289_v17  ;;  %vm334_vm8 = vmand %vm330_vm4, %vm326_vm3  ;;  %vm331_vm10 = vcmp.lt.s32.totalorder %v311_v29, 0  ;;  %v339_v50 = vadd.s32 3, %v311_v29  ;;  %vm328_vm15 = vcmp.ne.s32.totalorder %v322_v51, 0  ;;  %v398_v0 = vld [vmem:[%s826_s27 + $0x28] sm:$0xff]  ;;  %v399_v13 = vld [vmem:[%s826_s27 + $0x30] sm:$0x3f] }
  0x4d   : > { %vm345_vm5 = vcmp.eq.s32.totalorder %v341_v31, 0  ;;  %vm361_vm6 = vcmp.eq.s32.totalorder %v341_v31, 1  ;;  %vm377_vm7 = vcmp.eq.s32.totalorder %v341_v31, 2  ;;  %v342_v37 = vsel %vm334_vm8, %v338_v32, %v300_v26  ;;  %vm335_vm13 = vmand %vm331_vm10, %vm327_vm9  ;;  %v400_v14 = vld [vmem:[%s826_s27 + $0x38] sm:$0x3f] }
  0x4e   : > { %v351_v33 = vsel %vm345_vm5, %v814_v18, 0.0  ;;  %v357_v34 = vsel %vm345_vm5, %v817_v21, 0.0  ;;  %vm346_vm11 = vcmp.eq.s32.totalorder %v342_v37, 0  ;;  %vm362_vm12 = vcmp.eq.s32.totalorder %v342_v37, 1 }
  0x4f   : > { %v367_v38 = vsel %vm361_vm6, %v819_v22, %v351_v33  ;;  %v373_v39 = vsel %vm361_vm6, %v821_v23, %v357_v34  ;;  %v352_v42 = vsel %vm346_vm11, %v814_v18, 0.0  ;;  %v358_v43 = vsel %vm346_vm11, %v817_v21, 0.0 }
  0x50   : > { %v383_v40 = vsel %vm377_vm7, %v828_v27, %v367_v38  ;;  %v389_v41 = vsel %vm377_vm7, %v830_v28, %v373_v39  ;;  %v368_v46 = vsel %vm362_vm12, %v819_v22, %v352_v42  ;;  %v374_v47 = vsel %vm362_vm12, %v821_v23, %v358_v43 }
  0x51   : > { %v401_v44 = vmul.f32 %v393_v35, %v383_v40  ;;  %v402_v45 = vmul.f32 %v394_v36, %v383_v40  ;;  %vm378_vm14 = vcmp.eq.s32.totalorder %v342_v37, 2  ;;  %v343_v58 = vsel %vm335_vm13, %v339_v50, %v311_v29 }
  0x52   : > { %v384_v54 = vsel %vm378_vm14, %v828_v27, %v368_v46  ;;  %v390_v55 = vsel %vm378_vm14, %v830_v28, %v374_v47  ;;  %vm347_vm0 = vcmp.eq.s32.totalorder %v343_v58, 0  ;;  %vm363_vm1 = vcmp.eq.s32.totalorder %v343_v58, 1 }
  0x53   : > { %v409_v52 = vadd.f32 %v401_v44, %v389_v41  ;;  %v410_v53 = vadd.f32 %v402_v45, %v389_v41  ;;  %v403_v56 = vmul.f32 %v395_v48, %v384_v54  ;;  %v404_v57 = vmul.f32 %v396_v49, %v384_v54 }
  0x54   : > { %vm379_vm2 = vcmp.eq.s32.totalorder %v343_v58, 2  ;;  %vm332_vm3 = vcmp.lt.s32.totalorder %v322_v51, 0  ;;  %v353_v61 = vsel %vm347_vm0, %v814_v18, 0.0  ;;  %v359_v62 = vsel %vm347_vm0, %v817_v21, 0.0 }
  0x55   : > { %417 = vst [vmem:[%s852_s30] sm:$0xff] %v409_v52  ;;  %418 = vst [vmem:[%s852_s30 + $0x8] sm:$0xff] %v410_v53  ;;  %v411_v59 = vadd.f32 %v403_v56, %v390_v55  ;;  %v412_v60 = vadd.f32 %v404_v57, %v390_v55  ;;  %v369_v1 = vsel %vm363_vm1, %v819_v22, %v353_v61  ;;  %v340_v3 = vadd.s32 3, %v322_v51 }
  0x56   : > { %vm336_vm4 = vmand %vm332_vm3, %vm328_vm15  ;;  %v375_v2 = vsel %vm363_vm1, %v821_v23, %v359_v62  ;;  %v385_v4 = vsel %vm379_vm2, %v828_v27, %v369_v1 }
  0x57   : > { %419 = vst [vmem:[%s852_s30 + $0x10] sm:$0xff] %v411_v59  ;;  %420 = vst [vmem:[%s852_s30 + $0x18] sm:$0xff] %v412_v60  ;;  %v391_v5 = vsel %vm379_vm2, %v830_v28, %v375_v2  ;;  %v405_v6 = vmul.f32 %v397_v63, %v385_v4  ;;  %v406_v7 = vmul.f32 %v398_v0, %v385_v4 }
  0x58   : > { %v344_v8 = vsel %vm336_vm4, %v340_v3, %v322_v51 }
  0x59   : > { %vm348_vm5 = vcmp.eq.s32.totalorder %v344_v8, 0  ;;  %vm364_vm6 = vcmp.eq.s32.totalorder %v344_v8, 1  ;;  %vm380_vm7 = vcmp.eq.s32.totalorder %v344_v8, 2  ;;  %v413_v9 = vadd.f32 %v405_v6, %v391_v5 }
  0x5a   : > { %v414_v10 = vadd.f32 %v406_v7, %v391_v5  ;;  %v354_v11 = vsel %vm348_vm5, %v814_v18, 0.0  ;;  %v360_v12 = vsel %vm348_vm5, %v817_v21, 0.0 }
  0x5b   : > { %v370_v15 = vsel %vm364_vm6, %v819_v22, %v354_v11  ;;  %v376_v16 = vsel %vm364_vm6, %v821_v23, %v360_v12  ;;  %421 = vst [vmem:[%s852_s30 + $0x20] sm:$0xff] %v413_v9 }
  0x5c   : > { %422 = vst [vmem:[%s852_s30 + $0x28] sm:$0xff] %v414_v10  ;;  %v386_v17 = vsel %vm380_vm7, %v828_v27, %v370_v15  ;;  %v392_v19 = vsel %vm380_vm7, %v830_v28, %v376_v16 }
  0x5d   : > { %v407_v20 = vmul.f32 %v399_v13, %v386_v17  ;;  %v408_v24 = vmul.f32 %v400_v14, %v386_v17 }
  0x5f   : > { %v415_v25 = vadd.f32 %v407_v20, %v392_v19  ;;  %v416_v26 = vadd.f32 %v408_v24, %v392_v19 }
  0x61   : > { %423 = vst [vmem:[%s852_s30 + $0x30] sm:$0x3f] %v415_v25  ;;  %424 = vst [vmem:[%s852_s30 + $0x38] sm:$0x3f] %v416_v26 }
  0x62 PF: > { %s22_s0 = sadd.s32 1, %s698_s0   ;;  %s903_s20 = smov %s694_s21 }
  0x63   : > { %p19_p11 = scmp.ge.s32.totalorder %s22_s0, 4   ;;  %s904_s21 = smov %s906_s23 }
  0x65   :  { %21 = sbr.rel (!%p19_p11) target bundleno = 18 (0x12), region = 71 }
  0x6a   :  { %457 = vsyncpa [#allocation5], 1 }
  0x6b   :  { %459 = vsyncpa [#allocation5 + $0x1], 1 }
  0x6c   :  { %460 = vsyncpa [#allocation7], 1 }

</bundles_post_ra>
